<compile_context>
chip_gen: v5e
topology: v5e:2x2
jax: 0.10.0
libtpu: 0.0.40
codegen_flags: <defaults>
</compile_context>

<pallas_src>
import functools

import jax
import jax.numpy as jnp
from jax.experimental import pallas as pl
from jax.experimental.pallas import tpu as pltpu


LANE = 128          # output/lane padding target
TM_MAX = 1024       # row-tile cap: 2 (dbl-buf) * 1024 * 784 * 2B ~= 3.1 MiB -> fine on v7x


def _round_up(x, m):
    return ((x + m - 1) // m) * m


def _fcn_kernel(x_ref, w_ref, b_ref, o_ref):
    # x_ref: (TM, K) bf16, w_ref: (K, N_pad) bf16, b_ref: (1, N_pad) f32
    y = jnp.dot(x_ref[...], w_ref[...], preferred_element_type=jnp.float32)
    o_ref[...] = (y + b_ref[...]).astype(o_ref.dtype)


def prepare_fcn_params(weight, bias):
    """Hoist the transpose / lane-padding out of the per-call hot path.

    weight: (output_size, input_size)  -- PyTorch nn.Linear convention
    bias:   (output_size,)
    Returns (w_t_padded[K, N_pad] bf16, bias_padded[1, N_pad] f32).
    """
    output_size, input_size = weight.shape
    n_pad = _round_up(output_size, LANE)
    w_t = jnp.zeros((input_size, n_pad), dtype=jnp.bfloat16)
    w_t = w_t.at[:, :output_size].set(weight.T.astype(jnp.bfloat16))
    b2d = jnp.zeros((1, n_pad), dtype=jnp.float32)
    b2d = b2d.at[:, :output_size].set(bias.astype(jnp.float32))
    return w_t, b2d


@functools.partial(jax.jit, static_argnames=("input_size", "output_size"))
def fcn_forward(x, w_t_padded, b_padded, *, input_size, output_size):
    """FCN.forward: fc1(x.reshape(-1, input_size)) -> (N, output_size) f32."""
    x2d = x.reshape(-1, input_size).astype(jnp.bfloat16)  # bf16 activations (f32 accumulate)
    n = x2d.shape[0]
    k = input_size
    n_out_pad = w_t_padded.shape[1]

    # Row tiling: TM multiple of 8, capped; pad rows so the grid divides evenly.
    tm = min(TM_MAX, _round_up(n, 8))
    n_rows = _round_up(n, tm)
    if n_rows != n:
        x2d = jnp.pad(x2d, ((0, n_rows - n), (0, 0)))

    grid = (n_rows // tm,)

    cost = pl.CostEstimate(
        flops=2 * n_rows * k * n_out_pad,
        transcendentals=0,
        bytes_accessed=(x2d.size * 2 + w_t_padded.size * 2
                        + b_padded.size * 4 + n_rows * n_out_pad * 4),
    )

    out = pl.pallas_call(
        _fcn_kernel,
        out_shape=jax.ShapeDtypeStruct((n_rows, n_out_pad), jnp.float32),
        grid_spec=pltpu.PrefetchScalarGridSpec(
            num_scalar_prefetch=0,
            grid=grid,
            in_specs=[
                pl.BlockSpec((tm, k), lambda i: (i, 0)),           # x tile, pipelined
                pl.BlockSpec((k, n_out_pad), lambda i: (0, 0)),    # full W^T, resident
                pl.BlockSpec((1, n_out_pad), lambda i: (0, 0)),    # bias, resident
            ],
            out_specs=pl.BlockSpec((tm, n_out_pad), lambda i: (i, 0)),
        ),
        compiler_params=pltpu.CompilerParams(
            dimension_semantics=("parallel",),   # data-parallel rows -> both TCs on v7x
        ),
        cost_estimate=cost,
    )(x2d, w_t_padded, b_padded)

    # Slice away row padding and the lane padding of the output dimension.
    return out[:n, :output_size]


if __name__ == "__main__":
    input_size = 784
    output_size = 10
    batch = 2

    key = jax.random.PRNGKey(0)
    kx, kw, kb = jax.random.split(key, 3)

    # MNIST-ish image batch (N, C, H, W) = (2, 1, 28, 28)
    x = jax.random.normal(kx, (batch, 1, 28, 28), dtype=jnp.float32)

    # PyTorch nn.Linear init: U(-1/sqrt(in), 1/sqrt(in))
    bound = 1.0 / (input_size ** 0.5)
    weight = jax.random.uniform(kw, (output_size, input_size),
                                minval=-bound, maxval=bound, dtype=jnp.float32)
    bias = jax.random.uniform(kb, (output_size,),
                              minval=-bound, maxval=bound, dtype=jnp.float32)

    # One-time parameter prep (transpose + lane pad), outside the hot path.
    w_t_padded, b_padded = prepare_fcn_params(weight, bias)

    out = fcn_forward(x, w_t_padded, b_padded,
                      input_size=input_size, output_size=output_size)
    out = jax.block_until_ready(out)
    assert out.shape == (batch, output_size)

    # Reference with matching bf16-input / f32-accumulate numerics.
    x2d_f32 = x.reshape(-1, input_size)
    ref_bf16 = (x2d_f32.astype(jnp.bfloat16).astype(jnp.float32)
                @ weight.T.astype(jnp.bfloat16).astype(jnp.float32)) + bias
    assert jnp.allclose(out, ref_bf16, atol=1e-3, rtol=1e-3)

    # Sanity against the pure-f32 reference (looser tolerance for bf16 inputs).
    ref_f32 = x2d_f32 @ weight.T + bias
    assert jnp.allclose(out, ref_f32, atol=5e-2, rtol=5e-2)

    print("KERNEL_OK")
</pallas_src>

<mosaic_0001>
module attributes {stable_mosaic.version = 11 : i64} {
  func.func @_fcn_kernel(%arg0: i32, %arg1: memref<8x784xbf16, #tpu.memory_space<vmem>>, %arg2: memref<784x128xbf16, #tpu.memory_space<vmem>>, %arg3: memref<1x128xf32, #tpu.memory_space<vmem>>, %arg4: memref<8x128xf32, #tpu.memory_space<vmem>>) attributes {dimension_semantics = [#tpu.dimension_semantics<parallel>], iteration_bounds = array<i64: 1>, scalar_prefetch = 0 : i64, scratch_operands = 0 : i64, tpu.core_type = #tpu.core_type<tc>, window_params = [{transform_indices = @transform_0, window_bounds = array<i64: 8, 784>}, {pipeline_mode = #tpu.pipeline_mode<synchronous>, transform_indices = @transform_1, window_bounds = array<i64: 784, 128>}, {pipeline_mode = #tpu.pipeline_mode<synchronous>, transform_indices = @transform_2, window_bounds = array<i64: 1, 128>}, {transform_indices = @transform_3, window_bounds = array<i64: 8, 128>}]} {
    %c0 = arith.constant 0 : index
    %c0_0 = arith.constant 0 : index
    %0 = vector.load %arg1[%c0, %c0_0] : memref<8x784xbf16, #tpu.memory_space<vmem>>, vector<8x784xbf16>
    %c0_1 = arith.constant 0 : index
    %c0_2 = arith.constant 0 : index
    %1 = vector.load %arg2[%c0_1, %c0_2] : memref<784x128xbf16, #tpu.memory_space<vmem>>, vector<784x128xbf16>
    %cst = arith.constant dense<0.000000e+00> : vector<8x128xf32>
    %2 = tpu.matmul %0, %1, %cst {dimension_numbers = #tpu.dot_dimension_numbers<[1], [0], [0], [1], [0, 0, 1, 1], [], []>} : vector<8x784xbf16>, vector<784x128xbf16>, vector<8x128xf32> -> vector<8x128xf32>
    %c0_3 = arith.constant 0 : index
    %c0_4 = arith.constant 0 : index
    %3 = vector.load %arg3[%c0_3, %c0_4] : memref<1x128xf32, #tpu.memory_space<vmem>>, vector<1x128xf32>
    %4 = vector.broadcast %3 : vector<1x128xf32> to vector<8x128xf32>
    %5 = arith.addf %2, %4 : vector<8x128xf32>
    %c0_5 = arith.constant 0 : index
    %c0_6 = arith.constant 0 : index
    %6 = vector.load %arg4[%c0_5, %c0_6] : memref<8x128xf32, #tpu.memory_space<vmem>>, vector<8x128xf32>
    tpu.vector_store %arg4[%c0_5, %c0_6], %5 {strides = array<i32>} : memref<8x128xf32, #tpu.memory_space<vmem>>, vector<8x128xf32>,
    return
  }
  func.func @transform_0(%arg0: i32) -> (i32, i32) {
    %c0_i32 = arith.constant 0 : i32
    %c0_i32_0 = arith.constant 0 : i32
    return %arg0, %c0_i32 : i32, i32
  }
  func.func @transform_1(%arg0: i32) -> (i32, i32) {
    %c0_i32 = arith.constant 0 : i32
    %c0_i32_0 = arith.constant 0 : i32
    %c0_i32_1 = arith.constant 0 : i32
    return %c0_i32, %c0_i32_0 : i32, i32
  }
  func.func @transform_2(%arg0: i32) -> (i32, i32) {
    %c0_i32 = arith.constant 0 : i32
    %c0_i32_0 = arith.constant 0 : i32
    %c0_i32_1 = arith.constant 0 : i32
    return %c0_i32, %c0_i32_0 : i32, i32
  }
  func.func @transform_3(%arg0: i32) -> (i32, i32) {
    %c0_i32 = arith.constant 0 : i32
    %c0_i32_0 = arith.constant 0 : i32
    return %arg0, %c0_i32 : i32, i32
  }
}

</mosaic_0001>

<bundles_post_ra>
// kernel: fcn_forward.1
= control target key start
LH: loop header
LB: loop body
LE: loop exit
PB: predicated region body
PF: predicated region fallthrough
CT: control target
= control target key end

     0   :  { %8 = vsyncpa [#allocation3], 0  ;;  %s832_s15 = smov [#allocation2]   ;;  %s833_s17 = smov 64   ;;  %s876_s0 = inlined_call_operand.vmem [shape: bf16[8,784], index: 0, kind: input, shape index: {}]   ;;  %s877_s1 = inlined_call_operand.hbm [shape: bf16[784,128], index: 1, kind: input, shape index: {}]   ;;  %s878_s2 = inlined_call_operand.vmem [shape: f32[1,128], index: 2, kind: input, shape index: {}]   ;;  %s879_s3 = inlined_call_operand.vmem [shape: f32[8,128], index: 3, kind: output, shape index: {}]  }
   0x1   :  { %s15_s14 = sshll.u32 %s877_s1, 4  ;;  %s17_s16 = sshll.u32 %s832_s15, 4  ;;  %s16_s14 = int_to_ptr.hbm [resolvable:$true] %s15_s14  ;;  %s18_s16 = int_to_ptr.vmem [resolvable:$true] %s17_s16 }
   0x2   :  { %s834_s18 = smov 4  }
   0x3   :  { %23 = dma.hbm_to_vmem [thread:$0]  %s16_s14, 6272, %s18_s16, [#allocation3], %s833_s17, %s833_s17, %s834_s18  }
   0x4   :  { %830 = dma.done.wait [#allocation3], 6272  }
   0x5   :  { %831 = vsyncadd [#allocation3], 4294961024  ;;  %v760_v0 = vld [vmem:[#allocation2 + $0x38] sm:$0xff]  ;;  %v759_v3 = vld [vmem:[#allocation2 + $0x30] sm:$0xff]  ;;  %vm455_vm0 = vcmask 130048  }
   0x6   :  { %v768_v1 = vld [vmem:[#allocation2 + $0x78] sm:$0xff]  ;;  %459 = vmatpush.bf16.msra.mxu0 %v760_v0  ;;  %v767_v4 = vld [vmem:[#allocation2 + $0x70] sm:$0xff]  ;;  %v758_v8 = vld [vmem:[#allocation2 + $0x28] sm:$0xff] }
   0x7   :  { %v776_v2 = vld [vmem:[#allocation2 + $0xb8] sm:$0xff]  ;;  %472 = vmatpush.bf16.msra.mxu1 %v768_v1  ;;  %v775_v5 = vld [vmem:[#allocation2 + $0xb0] sm:$0xff]  ;;  %v766_v9 = vld [vmem:[#allocation2 + $0x68] sm:$0xff] }
   0x8   :  { %485 = vmatpush.bf16.msra.mxu2 %v776_v2  ;;  %v784_v6 = vld [vmem:[#allocation2 + $0xf8] sm:$0xff]  ;;  %v783_v7 = vld [vmem:[#allocation2 + $0xf0] sm:$0xff]  ;;  %v774_v10 = vld [vmem:[#allocation2 + $0xa8] sm:$0xff] }
   0x9   :  { %498 = vmatpush.bf16.msra.mxu3 %v784_v6  ;;  %v782_v11 = vld [vmem:[#allocation2 + $0xe8] sm:$0xff]  ;;  %v757_v12 = vld [vmem:[#allocation2 + $0x20] sm:$0xff]  ;;  %v756_v16 = vld [vmem:[#allocation2 + $0x18] sm:$0xff] }
   0xa   :  { %460 = vmatpush.bf16.msra.mxu0 %v759_v3  ;;  %v765_v13 = vld [vmem:[#allocation2 + $0x60] sm:$0xff]  ;;  %v764_v17 = vld [vmem:[#allocation2 + $0x58] sm:$0xff]  ;;  %v755_v20 = vld [vmem:[#allocation2 + $0x10] sm:$0xff] }
   0xb   :  { %473 = vmatpush.bf16.msra.mxu1 %v767_v4  ;;  %v773_v14 = vld [vmem:[#allocation2 + $0xa0] sm:$0xff]  ;;  %v772_v18 = vld [vmem:[#allocation2 + $0x98] sm:$0xff]  ;;  %v763_v21 = vld [vmem:[#allocation2 + $0x50] sm:$0xff] }
   0xc   :  { %486 = vmatpush.bf16.msra.mxu2 %v775_v5  ;;  %v781_v15 = vld [vmem:[#allocation2 + $0xe0] sm:$0xff]  ;;  %v780_v19 = vld [vmem:[#allocation2 + $0xd8] sm:$0xff]  ;;  %v771_v22 = vld [vmem:[#allocation2 + $0x90] sm:$0xff] }
   0xd   :  { %499 = vmatpush.bf16.msra.mxu3 %v783_v7  ;;  %v779_v23 = vld [vmem:[#allocation2 + $0xd0] sm:$0xff]  ;;  %v754_v24 = vld [vmem:[#allocation2 + $0x8] sm:$0xff]  ;;  %v31_v26 = vld [vmem:[%s876_s0] sm:$0xff] }
   0xe   :  { %461 = vmatpush.bf16.msra.mxu0 %v758_v8  ;;  %v762_v25 = vld [vmem:[#allocation2 + $0x48] sm:$0xff]  ;;  %v141_v30 = vunpack.c.l.b16 %v31_v26  ;;  %v142_v31 = vunpack.c.h.b16 %v31_v26  ;;  %v753_v32 = vld [vmem:[#allocation2] sm:$0xff]  ;;  %v792_v36 = vld [vmem:[#allocation2 + $0x138] sm:$0xff] }
   0xf   :  { %474 = vmatpush.bf16.msra.mxu1 %v766_v9  ;;  %v770_v27 = vld [vmem:[#allocation2 + $0x88] sm:$0xff]  ;;  %v761_v33 = vld [vmem:[#allocation2 + $0x40] sm:$0xff]  ;;  %v800_v37 = vld [vmem:[#allocation2 + $0x178] sm:$0xff] }
  0x10   :  { %487 = vmatpush.bf16.msra.mxu2 %v774_v10  ;;  %v32_v28 = vld [vmem:[%s876_s0 + $0x8] sm:$0xff]  ;;  %v769_v35 = vld [vmem:[#allocation2 + $0x80] sm:$0xff]  ;;  %v148_v39 = vpack.c.b16 %v141_v30, %v141_v30  ;;  %v149_v40 = vpack.c.b16 %v142_v31, %v142_v31  ;;  %v791_v44 = vld [vmem:[#allocation2 + $0x130] sm:$0xff] }
  0x11   :  { %500 = vmatpush.bf16.msra.mxu3 %v782_v11  ;;  %v778_v29 = vld [vmem:[#allocation2 + $0xc8] sm:$0xff]  ;;  %v143_v34 = vunpack.c.l.b16 %v32_v28  ;;  %v801_v38 = vld [vmem:[#allocation2 + $0x180] sm:$0xff]  ;;  %v144_v41 = vunpack.c.h.b16 %v32_v28  ;;  %v799_v45 = vld [vmem:[#allocation2 + $0x170] sm:$0xff] }
  0x12   :  { %462 = vmatpush.bf16.msra.mxu0 %v757_v12  ;;  %v777_v43 = vld [vmem:[#allocation2 + $0xc0] sm:$0xff]  ;;  %v790_v47 = vld [vmem:[#allocation2 + $0x128] sm:$0xff]  ;;  %v34_v50 = vld [vmem:[%s876_s0 + $0x18] sm:$0xf] }
  0x13   :  { %475 = vmatpush.bf16.msra.mxu1 %v765_v13  ;;  %v150_v42 = vpack.c.b16 %v143_v34, %v143_v34  ;;  %v151_v46 = vpack.c.b16 %v144_v41, %v144_v41  ;;  %v798_v48 = vld [vmem:[#allocation2 + $0x168] sm:$0xff]  ;;  %v789_v49 = vld [vmem:[#allocation2 + $0x120] sm:$0xff]  ;;  %v147_v52 = vunpack.c.l.b16 %v34_v50  ;;  %v788_v53 = vld [vmem:[#allocation2 + $0x118] sm:$0xff] }
  0x14   :  { %488 = vmatpush.bf16.msra.mxu2 %v773_v14  ;;  %v797_v51 = vld [vmem:[#allocation2 + $0x160] sm:$0xff]  ;;  %v796_v54 = vld [vmem:[#allocation2 + $0x158] sm:$0xff]  ;;  %v787_v56 = vld [vmem:[#allocation2 + $0x110] sm:$0xff] }
  0x15   :  { %501 = vmatpush.bf16.msra.mxu3 %v781_v15  ;;  %v154_v55 = vpack.c.b16 %v147_v52, %v147_v52  ;;  %v795_v57 = vld [vmem:[#allocation2 + $0x150] sm:$0xff]  ;;  %v786_v58 = vld [vmem:[#allocation2 + $0x108] sm:$0xff]  ;;  %v785_v62 = vld [vmem:[#allocation2 + $0x100] sm:$0xff] }
  0x16   :  { %463 = vmatpush.bf16.msra.mxu0 %v756_v16  ;;  %v33_v59 = vld [vmem:[%s876_s0 + $0x10] sm:$0xff]  ;;  %v794_v60 = vld [vmem:[#allocation2 + $0x148] sm:$0xff]  ;;  %v793_v0 = vld [vmem:[#allocation2 + $0x140] sm:$0xff] }
  0x17   :  { %476 = vmatpush.bf16.msra.mxu1 %v764_v17  ;;  %v145_v61 = vunpack.c.l.b16 %v33_v59  ;;  %v146_v63 = vunpack.c.h.b16 %v33_v59  ;;  %v805_v9 = vld [vmem:[%s878_s2] ss:$0 sm:$0xff] }
  0x18   :  { %489 = vmatpush.bf16.msra.mxu2 %v772_v18 }
  0x19   :  { %502 = vmatpush.bf16.msra.mxu3 %v780_v19  ;;  %v152_v1 = vpack.c.b16 %v145_v61, %v145_v61  ;;  %v153_v2 = vpack.c.b16 %v146_v63, %v146_v63 }
  0x1a   :  { %464 = vmatpush.bf16.msra.mxu0 %v755_v20 }
  0x1b   :  { %477 = vmatpush.bf16.msra.mxu1 %v763_v21 }
  0x1c   :  { %490 = vmatpush.bf16.msra.mxu2 %v771_v22 }
  0x1d   :  { %503 = vmatpush.bf16.msra.mxu3 %v779_v23 }
  0x1e   :  { %465 = vmatpush.bf16.msra.mxu0 %v754_v24 }
  0x1f   :  { %478 = vmatpush.bf16.msra.mxu1 %v762_v25 }
  0x20   :  { %491 = vmatpush.bf16.msra.mxu2 %v770_v27 }
  0x21   :  { %504 = vmatpush.bf16.msra.mxu3 %v778_v29 }
  0x22   :  { %466 = vmatpush.bf16.msra.mxu0 %v753_v32 }
  0x23   :  { %479 = vmatpush.bf16.msra.mxu1 %v761_v33 }
  0x24   :  { %492 = vmatpush.bf16.msra.mxu2 %v769_v35 }
  0x25   :  { %467 = vmatmul.bf16.vlgmr.msra.gmra.mxu0 %v148_v39  ;;  %505 = vmatpush.bf16.msra.mxu3 %v777_v43 }
  0x26   :  { %511 = vmatpush.bf16.msrb.mxu0 %v792_v36  ;;  %480 = vmatmul.bf16.vlgmr.msra.gmra.mxu1 %v149_v40 }
  0x27   :  { %524 = vmatpush.bf16.msrb.mxu1 %v800_v37  ;;  %493 = vmatmul.bf16.vlgmr.msra.gmra.mxu2 %v150_v42 }
  0x28   :  { %544 = vmatpush.bf16.msrb.mxu2 %v801_v38  ;;  %506 = vmatmul.bf16.vlgmr.msra.gmra.mxu3 %v151_v46 }
  0x2a   :  { %512 = vmatpush.bf16.msrb.mxu0 %v791_v44 }
  0x2b   :  { %525 = vmatpush.bf16.msrb.mxu1 %v799_v45 }
  0x2e   :  { %513 = vmatpush.bf16.msrb.mxu0 %v790_v47 }
  0x2f   :  { %526 = vmatpush.bf16.msrb.mxu1 %v798_v48 }
  0x32   :  { %514 = vmatpush.bf16.msrb.mxu0 %v789_v49 }
  0x33   :  { %527 = vmatpush.bf16.msrb.mxu1 %v797_v51 }
  0x36   :  { %515 = vmatpush.bf16.msrb.mxu0 %v788_v53 }
  0x37   :  { %528 = vmatpush.bf16.msrb.mxu1 %v796_v54  ;;  %752 = vmatmul.msk.bf16.vlgmr.msrb.gmra.mxu2 %vm455_vm0, %v154_v55 }
  0x3a   :  { %516 = vmatpush.bf16.msrb.mxu0 %v787_v56 }
  0x3b   :  { %529 = vmatpush.bf16.msrb.mxu1 %v795_v57 }
  0x3e   :  { %517 = vmatpush.bf16.msrb.mxu0 %v786_v58 }
  0x3f   :  { %530 = vmatpush.bf16.msrb.mxu1 %v794_v60 }
  0x42   :  { %518 = vmatpush.bf16.msrb.mxu0 %v785_v62 }
  0x43   :  { %531 = vmatpush.bf16.msrb.mxu1 %v793_v0 }
  0x45   :  { %519 = vmatmul.bf16.vlgmr.msrb.gmra.mxu0 %v152_v1 }
  0x46   :  { %532 = vmatmul.bf16.vlgmr.msrb.gmra.mxu1 %v153_v2 }
  0xa2   :  { %v468_v3 = vpop.f32.mrf.mxu0 }
  0xa3   :  { %v481_v4 = vpop.f32.mrf.mxu1  ;;  %v469_v11 = vadd.f32 %v805_v9, %v468_v3 }
  0xa5   :  { %v482_v13 = vadd.f32 %v481_v4, %v469_v11 }
  0xaa   :  { %v494_v5 = vpop.f32.mrf.mxu2  ;;  %v470_v6 = vpop.f32.mrf.mxu0 }
  0xab   :  { %v483_v7 = vpop.f32.mrf.mxu1  ;;  %v507_v8 = vpop.f32.mrf.mxu3  ;;  %v495_v15 = vadd.f32 %v494_v5, %v482_v13 }
  0xad   :  { %v508_v16 = vadd.f32 %v507_v8, %v495_v15 }
  0xb2   :  { %v496_v10 = vpop.f32.mrf.mxu2 }
  0xb3   :  { %v509_v12 = vpop.f32.mrf.mxu3 }
  0xba   :  { %v546_v14 = vpop.f32.mrf.mxu2 }
  0xc2   :  { %v520_v17 = vpop.f32.mrf.mxu0  ;;  %v548_v20 = vpop.f32.mrf.mxu2 }
  0xc3   :  { %v521_v18 = vadd.f32 %v520_v17, %v508_v16  ;;  %v533_v19 = vpop.f32.mrf.mxu1 }
  0xc5   :  { %v534_v21 = vadd.f32 %v533_v19, %v521_v18 }
  0xc7   :  { %v547_v22 = vadd.f32 %v546_v14, %v534_v21 }
  0xc9   :  { %550 = vst [vmem:[%s879_s3] sm:$0xff] %v547_v22 }
  0xca   :  { %v522_v23 = vpop.f32.mrf.mxu0 }
  0xcb   :  { %v535_v24 = vpop.f32.mrf.mxu1 }
  0xcc   :  { %555 = vsyncpa [#allocation3], 1 }

</bundles_post_ra>
